<compile_context>
chip_gen: v7x
topology: tpu7x:2x2x1
jax: 0.10.0
libtpu: 0.0.40
codegen_flags: <defaults>
</compile_context>

<pallas_src>
import jax
import jax.numpy as jnp
from jax import lax
from jax.experimental import pallas as pl
from jax.experimental.pallas import tpu as pltpu


# ---------------------------------------------------------------------------
# Host/trace-time weight preparation
# ---------------------------------------------------------------------------
def _band_conv_weight(w_hwio, w_in):
    """Banded matrix M of shape (KH*w_in*Ci, Wo*Co) with
    M[kh*w_in*Ci + wi*Ci + ci, wo*Co + co] = w_hwio[kh, wi-wo, ci, co] (0 outside the band),
    so that  concat_kh(x_rows[h+kh]) @ M  == VALID conv output row h in (w, c) lane order."""
    KH, KW, Ci, Co = w_hwio.shape
    Wo = w_in - KW + 1
    sel = (jnp.arange(w_in)[:, None, None]
           == (jnp.arange(Wo)[None, :, None] + jnp.arange(KW)[None, None, :])
           ).astype(w_hwio.dtype)                              # (w_in, Wo, KW)
    m = jnp.einsum("vwk,hkco->hvcwo", sel, w_hwio)             # (KH, w_in, Ci, Wo, Co)
    return m.reshape(KH * w_in * Ci, Wo * Co)


# ---------------------------------------------------------------------------
# Fused forward pass (single pallas_call)
# ---------------------------------------------------------------------------
def alexnet_mini_forward(x_nchw, params):
    N, Cin, H, W = x_nchw.shape
    w1, b1 = params["conv1_w"], params["conv1_b"]
    w2, b2 = params["conv2_w"], params["conv2_b"]
    fc1_w, fc1_b = params["fc1_w"], params["fc1_b"]
    fc2_w, fc2_b = params["fc2_w"], params["fc2_b"]

    KH, KW, _, C1 = w1.shape
    C2 = w2.shape[-1]
    H1, W1 = H - KH + 1, W - KW + 1          # conv1 output
    H2, W2 = H1 - KH + 1, W1 - KW + 1        # conv2 output
    Hp, Wp = H2 // 2, W2 // 2                # after 2x2/stride-2 maxpool
    feat = C2 * Hp * Wp
    NC = fc2_w.shape[1]

    # Input: NCHW -> per-image "rows = h, lanes = (w, c)" 2-D layout.
    x_rows = jnp.transpose(x_nchw, (0, 2, 3, 1)).reshape(N, H, W * Cin)

    # Conv weights as banded matmul operands; biases tiled over w to match (w, c) lanes.
    w1_band = _band_conv_weight(w1, W)                       # (KH*W*Cin,  W1*C1)
    w2_band = _band_conv_weight(w2, W1)                      # (KH*W1*C1,  W2*C2)
    b1_row = jnp.tile(b1, W1).reshape(1, W1 * C1)
    b2_row = jnp.tile(b2, W2).reshape(1, W2 * C2)

    # Fold the PyTorch NCHW flatten permutation into fc1's weight rows:
    # kernel flattens in (h, w, c) order, PyTorch flattens in (c, h, w) order.
    fc1_w_hwc = fc1_w.reshape(C2, Hp, Wp, -1).transpose(1, 2, 0, 3).reshape(feat, -1)
    fc1_b_row = fc1_b.reshape(1, -1)
    fc2_b_row = fc2_b.reshape(1, -1)

    def kernel(x_ref, w1_ref, b1_ref, w2_ref, b2_ref,
               w3_ref, b3_ref, w4_ref, b4_ref, o_ref):
        # TODO(synk): Dropout(0.25)/Dropout(0.5) are inference-mode identities (no RNG masking).

        def conv3x3_relu(inp, w_band, b_row):
            # inp: (Hi, Wi*Ci) rows=h, lanes=(w, ci); one MXU matmul per conv layer.
            Ho = inp.shape[0] - KH + 1
            lhs = jnp.concatenate([inp[kh:kh + Ho, :] for kh in range(KH)], axis=1)
            y = jnp.dot(lhs, w_band, preferred_element_type=jnp.float32) + b_row
            return jnp.maximum(y, 0.0)

        y = conv3x3_relu(x_ref[0], w1_ref[...], b1_ref[...])      # (H1, W1*C1)
        y = conv3x3_relu(y, w2_ref[...], b2_ref[...])             # (H2, W2*C2)

        # 2x2 / stride-2 max-pool fused with the flatten (no masked per-column stores).
        hp = jnp.concatenate(
            [jnp.maximum(y[2 * i:2 * i + 1, :], y[2 * i + 1:2 * i + 2, :])
             for i in range(Hp)], axis=0)                         # (Hp, W2*C2)
        wp = jnp.concatenate(
            [jnp.maximum(hp[:, 2 * j * C2:(2 * j + 1) * C2],
                         hp[:, (2 * j + 1) * C2:(2 * j + 2) * C2])
             for j in range(Wp)], axis=1)                         # (Hp, Wp*C2)
        flat = jnp.concatenate([wp[h:h + 1, :] for h in range(Hp)], axis=1)  # (1, feat) (h,w,c)

        # Classifier: Linear(feat->16) + ReLU + Linear(16->num_classes).
        h1 = jnp.maximum(
            jnp.dot(flat, w3_ref[...], preferred_element_type=jnp.float32) + b3_ref[...], 0.0)
        logits = jnp.dot(h1, w4_ref[...], preferred_element_type=jnp.float32) + b4_ref[...]
        o_ref[0] = logits.astype(o_ref.dtype)

    out = pl.pallas_call(
        kernel,
        grid=(N,),
        in_specs=[
            pl.BlockSpec((1, H, W * Cin), lambda n: (n, 0, 0)),
            pl.BlockSpec(w1_band.shape, lambda n: (0, 0)),
            pl.BlockSpec(b1_row.shape, lambda n: (0, 0)),
            pl.BlockSpec(w2_band.shape, lambda n: (0, 0)),
            pl.BlockSpec(b2_row.shape, lambda n: (0, 0)),
            pl.BlockSpec(fc1_w_hwc.shape, lambda n: (0, 0)),
            pl.BlockSpec(fc1_b_row.shape, lambda n: (0, 0)),
            pl.BlockSpec(fc2_w.shape, lambda n: (0, 0)),
            pl.BlockSpec(fc2_b_row.shape, lambda n: (0, 0)),
        ],
        out_specs=pl.BlockSpec((1, 1, NC), lambda n: (n, 0, 0)),
        out_shape=jax.ShapeDtypeStruct((N, 1, NC), jnp.float32),
        compiler_params=pltpu.CompilerParams(dimension_semantics=("parallel",)),
    )(x_rows, w1_band, b1_row, w2_band, b2_row,
      fc1_w_hwc, fc1_b_row, fc2_w, fc2_b_row)
    return out.reshape(N, NC)


# ---------------------------------------------------------------------------
# Deterministic parameter init + pure-JAX reference
# ---------------------------------------------------------------------------
def init_params(key, C, H, W, num_classes):
    H1, W1 = H - 2, W - 2
    H2, W2 = H1 - 2, W1 - 2
    Hp, Wp = H2 // 2, W2 // 2
    feat = 8 * Hp * Wp
    ks = jax.random.split(key, 8)
    return {
        "conv1_w": 0.2 * jax.random.normal(ks[0], (3, 3, C, 4), jnp.float32),
        "conv1_b": 0.1 * jax.random.normal(ks[1], (4,), jnp.float32),
        "conv2_w": 0.2 * jax.random.normal(ks[2], (3, 3, 4, 8), jnp.float32),
        "conv2_b": 0.1 * jax.random.normal(ks[3], (8,), jnp.float32),
        "fc1_w": 0.1 * jax.random.normal(ks[4], (feat, 16), jnp.float32),
        "fc1_b": 0.1 * jax.random.normal(ks[5], (16,), jnp.float32),
        "fc2_w": 0.1 * jax.random.normal(ks[6], (16, num_classes), jnp.float32),
        "fc2_b": 0.1 * jax.random.normal(ks[7], (num_classes,), jnp.float32),
    }


def reference_forward(x_nchw, params):
    x = jnp.transpose(x_nchw, (0, 2, 3, 1))
    dn = ("NHWC", "HWIO", "NHWC")
    y = lax.conv_general_dilated(x, params["conv1_w"], (1, 1), "VALID",
                                 dimension_numbers=dn,
                                 precision=lax.Precision.HIGHEST) + params["conv1_b"]
    y = jnp.maximum(y, 0.0)
    y = lax.conv_general_dilated(y, params["conv2_w"], (1, 1), "VALID",
                                 dimension_numbers=dn,
                                 precision=lax.Precision.HIGHEST) + params["conv2_b"]
    y = jnp.maximum(y, 0.0)
    y = lax.reduce_window(y, -jnp.inf, lax.max, (1, 2, 2, 1), (1, 2, 2, 1), "VALID")
    flat = jnp.transpose(y, (0, 3, 1, 2)).reshape(y.shape[0], -1)   # PyTorch NCHW flatten
    h = jnp.maximum(flat @ params["fc1_w"] + params["fc1_b"], 0.0)
    return h @ params["fc2_w"] + params["fc2_b"]


if __name__ == "__main__":
    key = jax.random.PRNGKey(0)
    N, C, H, W = 2, 4, 16, 16        # input_shape (H, W, C) = (16, 16, 4), batch = 2
    num_classes = 16
    k_x, k_p = jax.random.split(key)
    x = jax.random.normal(k_x, (N, C, H, W), jnp.float32)
    params = init_params(k_p, C, H, W, num_classes)

    fwd = jax.jit(alexnet_mini_forward)
    out = jax.block_until_ready(fwd(x, params))
    assert out.shape == (N, num_classes), out.shape

    ref = jax.block_until_ready(reference_forward(x, params))
    max_diff = float(jnp.max(jnp.abs(out - ref)))
    assert jnp.allclose(out, ref, rtol=5e-3, atol=5e-3), f"max abs diff {max_diff}"

    print("KERNEL_OK")
</pallas_src>

<mosaic_0001>
module attributes {stable_mosaic.version = 11 : i64} {
  func.func @kernel(%arg0: i32, %arg1: memref<1x16x64xf32, #tpu.memory_space<vmem>>, %arg2: memref<192x56xf32, #tpu.memory_space<vmem>>, %arg3: memref<1x56xf32, #tpu.memory_space<vmem>>, %arg4: memref<168x96xf32, #tpu.memory_space<vmem>>, %arg5: memref<1x96xf32, #tpu.memory_space<vmem>>, %arg6: memref<288x16xf32, #tpu.memory_space<vmem>>, %arg7: memref<1x16xf32, #tpu.memory_space<vmem>>, %arg8: memref<16x16xf32, #tpu.memory_space<vmem>>, %arg9: memref<1x16xf32, #tpu.memory_space<vmem>>, %arg10: memref<1x1x16xf32, #tpu.memory_space<vmem>>) attributes {dimension_semantics = [#tpu.dimension_semantics<parallel>], iteration_bounds = array<i64: 2>, scalar_prefetch = 0 : i64, scratch_operands = 0 : i64, tpu.core_type = #tpu.core_type<tc>, window_params = [{transform_indices = @transform_0, window_bounds = array<i64: 1, 16, 64>}, {pipeline_mode = #tpu.pipeline_mode<synchronous>, transform_indices = @transform_1, window_bounds = array<i64: 192, 56>}, {pipeline_mode = #tpu.pipeline_mode<synchronous>, transform_indices = @transform_2, window_bounds = array<i64: 1, 56>}, {pipeline_mode = #tpu.pipeline_mode<synchronous>, transform_indices = @transform_3, window_bounds = array<i64: 168, 96>}, {pipeline_mode = #tpu.pipeline_mode<synchronous>, transform_indices = @transform_4, window_bounds = array<i64: 1, 96>}, {pipeline_mode = #tpu.pipeline_mode<synchronous>, transform_indices = @transform_5, window_bounds = array<i64: 288, 16>}, {pipeline_mode = #tpu.pipeline_mode<synchronous>, transform_indices = @transform_6, window_bounds = array<i64: 1, 16>}, {pipeline_mode = #tpu.pipeline_mode<synchronous>, transform_indices = @transform_7, window_bounds = array<i64: 16, 16>}, {pipeline_mode = #tpu.pipeline_mode<synchronous>, transform_indices = @transform_8, window_bounds = array<i64: 1, 16>}, {transform_indices = @transform_9, window_bounds = array<i64: 1, 1, 16>}]} {
    %c0 = arith.constant 0 : index
    %c0_0 = arith.constant 0 : index
    %c0_1 = arith.constant 0 : index
    %0 = vector.load %arg1[%c0, %c0_0, %c0_1] : memref<1x16x64xf32, #tpu.memory_space<vmem>>, vector<1x16x64xf32>
    %1 = vector.shape_cast %0 : vector<1x16x64xf32> to vector<16x64xf32>
    %c0_2 = arith.constant 0 : index
    %c0_3 = arith.constant 0 : index
    %2 = vector.load %arg2[%c0_2, %c0_3] : memref<192x56xf32, #tpu.memory_space<vmem>>, vector<192x56xf32>
    %c0_4 = arith.constant 0 : index
    %c0_5 = arith.constant 0 : index
    %3 = vector.load %arg3[%c0_4, %c0_5] : memref<1x56xf32, #tpu.memory_space<vmem>>, vector<1x56xf32>
    %4 = vector.extract_strided_slice %1 {offsets = [0, 0], sizes = [14, 64], strides = [1, 1]} : vector<16x64xf32> to vector<14x64xf32>
    %5 = vector.extract_strided_slice %1 {offsets = [1, 0], sizes = [14, 64], strides = [1, 1]} : vector<16x64xf32> to vector<14x64xf32>
    %6 = vector.extract_strided_slice %1 {offsets = [2, 0], sizes = [14, 64], strides = [1, 1]} : vector<16x64xf32> to vector<14x64xf32>
    %7 = tpu.concatenate %4, %5, %6 in 1 : vector<14x64xf32>, vector<14x64xf32>, vector<14x64xf32> -> vector<14x192xf32>
    %cst = arith.constant dense<0.000000e+00> : vector<14x56xf32>
    %8 = tpu.matmul %7, %2, %cst {dimension_numbers = #tpu.dot_dimension_numbers<[1], [0], [0], [1], [0, 0, 1, 1], [], []>} : vector<14x192xf32>, vector<192x56xf32>, vector<14x56xf32> -> vector<14x56xf32>
    %9 = vector.broadcast %3 : vector<1x56xf32> to vector<14x56xf32>
    %10 = arith.addf %8, %9 : vector<14x56xf32>
    %cst_6 = arith.constant 0.000000e+00 : f32
    %11 = vector.broadcast %cst_6 : f32 to vector<14x56xf32>
    %12 = arith.maximumf %10, %11 : vector<14x56xf32>
    %c0_7 = arith.constant 0 : index
    %c0_8 = arith.constant 0 : index
    %13 = vector.load %arg4[%c0_7, %c0_8] : memref<168x96xf32, #tpu.memory_space<vmem>>, vector<168x96xf32>
    %c0_9 = arith.constant 0 : index
    %c0_10 = arith.constant 0 : index
    %14 = vector.load %arg5[%c0_9, %c0_10] : memref<1x96xf32, #tpu.memory_space<vmem>>, vector<1x96xf32>
    %15 = vector.extract_strided_slice %12 {offsets = [0, 0], sizes = [12, 56], strides = [1, 1]} : vector<14x56xf32> to vector<12x56xf32>
    %16 = vector.extract_strided_slice %12 {offsets = [1, 0], sizes = [12, 56], strides = [1, 1]} : vector<14x56xf32> to vector<12x56xf32>
    %17 = vector.extract_strided_slice %12 {offsets = [2, 0], sizes = [12, 56], strides = [1, 1]} : vector<14x56xf32> to vector<12x56xf32>
    %18 = tpu.concatenate %15, %16, %17 in 1 : vector<12x56xf32>, vector<12x56xf32>, vector<12x56xf32> -> vector<12x168xf32>
    %cst_11 = arith.constant dense<0.000000e+00> : vector<12x96xf32>
    %19 = tpu.matmul %18, %13, %cst_11 {dimension_numbers = #tpu.dot_dimension_numbers<[1], [0], [0], [1], [0, 0, 1, 1], [], []>} : vector<12x168xf32>, vector<168x96xf32>, vector<12x96xf32> -> vector<12x96xf32>
    %20 = vector.broadcast %14 : vector<1x96xf32> to vector<12x96xf32>
    %21 = arith.addf %19, %20 : vector<12x96xf32>
    %cst_12 = arith.constant 0.000000e+00 : f32
    %22 = vector.broadcast %cst_12 : f32 to vector<12x96xf32>
    %23 = arith.maximumf %21, %22 : vector<12x96xf32>
    %24 = vector.extract_strided_slice %23 {offsets = [0, 0], sizes = [1, 96], strides = [1, 1]} : vector<12x96xf32> to vector<1x96xf32>
    %25 = vector.extract_strided_slice %23 {offsets = [1, 0], sizes = [1, 96], strides = [1, 1]} : vector<12x96xf32> to vector<1x96xf32>
    %26 = arith.maximumf %24, %25 : vector<1x96xf32>
    %27 = vector.extract_strided_slice %23 {offsets = [2, 0], sizes = [1, 96], strides = [1, 1]} : vector<12x96xf32> to vector<1x96xf32>
    %28 = vector.extract_strided_slice %23 {offsets = [3, 0], sizes = [1, 96], strides = [1, 1]} : vector<12x96xf32> to vector<1x96xf32>
    %29 = arith.maximumf %27, %28 : vector<1x96xf32>
    %30 = vector.extract_strided_slice %23 {offsets = [4, 0], sizes = [1, 96], strides = [1, 1]} : vector<12x96xf32> to vector<1x96xf32>
    %31 = vector.extract_strided_slice %23 {offsets = [5, 0], sizes = [1, 96], strides = [1, 1]} : vector<12x96xf32> to vector<1x96xf32>
    %32 = arith.maximumf %30, %31 : vector<1x96xf32>
    %33 = vector.extract_strided_slice %23 {offsets = [6, 0], sizes = [1, 96], strides = [1, 1]} : vector<12x96xf32> to vector<1x96xf32>
    %34 = vector.extract_strided_slice %23 {offsets = [7, 0], sizes = [1, 96], strides = [1, 1]} : vector<12x96xf32> to vector<1x96xf32>
    %35 = arith.maximumf %33, %34 : vector<1x96xf32>
    %36 = vector.extract_strided_slice %23 {offsets = [8, 0], sizes = [1, 96], strides = [1, 1]} : vector<12x96xf32> to vector<1x96xf32>
    %37 = vector.extract_strided_slice %23 {offsets = [9, 0], sizes = [1, 96], strides = [1, 1]} : vector<12x96xf32> to vector<1x96xf32>
    %38 = arith.maximumf %36, %37 : vector<1x96xf32>
    %39 = vector.extract_strided_slice %23 {offsets = [10, 0], sizes = [1, 96], strides = [1, 1]} : vector<12x96xf32> to vector<1x96xf32>
    %40 = vector.extract_strided_slice %23 {offsets = [11, 0], sizes = [1, 96], strides = [1, 1]} : vector<12x96xf32> to vector<1x96xf32>
    %41 = arith.maximumf %39, %40 : vector<1x96xf32>
    %42 = tpu.concatenate %26, %29, %32, %35, %38, %41 in 0 : vector<1x96xf32>, vector<1x96xf32>, vector<1x96xf32>, vector<1x96xf32>, vector<1x96xf32>, vector<1x96xf32> -> vector<6x96xf32>
    %43 = vector.extract_strided_slice %42 {offsets = [0, 0], sizes = [6, 8], strides = [1, 1]} : vector<6x96xf32> to vector<6x8xf32>
    %44 = vector.extract_strided_slice %42 {offsets = [0, 8], sizes = [6, 8], strides = [1, 1]} : vector<6x96xf32> to vector<6x8xf32>
    %45 = arith.maximumf %43, %44 : vector<6x8xf32>
    %46 = vector.extract_strided_slice %42 {offsets = [0, 16], sizes = [6, 8], strides = [1, 1]} : vector<6x96xf32> to vector<6x8xf32>
    %47 = vector.extract_strided_slice %42 {offsets = [0, 24], sizes = [6, 8], strides = [1, 1]} : vector<6x96xf32> to vector<6x8xf32>
    %48 = arith.maximumf %46, %47 : vector<6x8xf32>
    %49 = vector.extract_strided_slice %42 {offsets = [0, 32], sizes = [6, 8], strides = [1, 1]} : vector<6x96xf32> to vector<6x8xf32>
    %50 = vector.extract_strided_slice %42 {offsets = [0, 40], sizes = [6, 8], strides = [1, 1]} : vector<6x96xf32> to vector<6x8xf32>
    %51 = arith.maximumf %49, %50 : vector<6x8xf32>
    %52 = vector.extract_strided_slice %42 {offsets = [0, 48], sizes = [6, 8], strides = [1, 1]} : vector<6x96xf32> to vector<6x8xf32>
    %53 = vector.extract_strided_slice %42 {offsets = [0, 56], sizes = [6, 8], strides = [1, 1]} : vector<6x96xf32> to vector<6x8xf32>
    %54 = arith.maximumf %52, %53 : vector<6x8xf32>
    %55 = vector.extract_strided_slice %42 {offsets = [0, 64], sizes = [6, 8], strides = [1, 1]} : vector<6x96xf32> to vector<6x8xf32>
    %56 = vector.extract_strided_slice %42 {offsets = [0, 72], sizes = [6, 8], strides = [1, 1]} : vector<6x96xf32> to vector<6x8xf32>
    %57 = arith.maximumf %55, %56 : vector<6x8xf32>
    %58 = vector.extract_strided_slice %42 {offsets = [0, 80], sizes = [6, 8], strides = [1, 1]} : vector<6x96xf32> to vector<6x8xf32>
    %59 = vector.extract_strided_slice %42 {offsets = [0, 88], sizes = [6, 8], strides = [1, 1]} : vector<6x96xf32> to vector<6x8xf32>
    %60 = arith.maximumf %58, %59 : vector<6x8xf32>
    %61 = tpu.concatenate %45, %48, %51, %54, %57, %60 in 1 : vector<6x8xf32>, vector<6x8xf32>, vector<6x8xf32>, vector<6x8xf32>, vector<6x8xf32>, vector<6x8xf32> -> vector<6x48xf32>
    %62 = vector.extract_strided_slice %61 {offsets = [0, 0], sizes = [1, 48], strides = [1, 1]} : vector<6x48xf32> to vector<1x48xf32>
    %63 = vector.extract_strided_slice %61 {offsets = [1, 0], sizes = [1, 48], strides = [1, 1]} : vector<6x48xf32> to vector<1x48xf32>
    %64 = vector.extract_strided_slice %61 {offsets = [2, 0], sizes = [1, 48], strides = [1, 1]} : vector<6x48xf32> to vector<1x48xf32>
    %65 = vector.extract_strided_slice %61 {offsets = [3, 0], sizes = [1, 48], strides = [1, 1]} : vector<6x48xf32> to vector<1x48xf32>
    %66 = vector.extract_strided_slice %61 {offsets = [4, 0], sizes = [1, 48], strides = [1, 1]} : vector<6x48xf32> to vector<1x48xf32>
    %67 = vector.extract_strided_slice %61 {offsets = [5, 0], sizes = [1, 48], strides = [1, 1]} : vector<6x48xf32> to vector<1x48xf32>
    %68 = tpu.concatenate %62, %63, %64, %65, %66, %67 in 1 : vector<1x48xf32>, vector<1x48xf32>, vector<1x48xf32>, vector<1x48xf32>, vector<1x48xf32>, vector<1x48xf32> -> vector<1x288xf32>
    %c0_13 = arith.constant 0 : index
    %c0_14 = arith.constant 0 : index
    %69 = vector.load %arg6[%c0_13, %c0_14] : memref<288x16xf32, #tpu.memory_space<vmem>>, vector<288x16xf32>
    %cst_15 = arith.constant dense<0.000000e+00> : vector<1x16xf32>
    %70 = tpu.matmul %68, %69, %cst_15 {dimension_numbers = #tpu.dot_dimension_numbers<[1], [0], [0], [1], [0, 0, 1, 1], [], []>} : vector<1x288xf32>, vector<288x16xf32>, vector<1x16xf32> -> vector<1x16xf32>
    %c0_16 = arith.constant 0 : index
    %c0_17 = arith.constant 0 : index
    %71 = vector.load %arg7[%c0_16, %c0_17] : memref<1x16xf32, #tpu.memory_space<vmem>>, vector<1x16xf32>
    %72 = arith.addf %70, %71 : vector<1x16xf32>
    %cst_18 = arith.constant 0.000000e+00 : f32
    %73 = vector.broadcast %cst_18 : f32 to vector<1x16xf32>
    %74 = arith.maximumf %72, %73 : vector<1x16xf32>
    %c0_19 = arith.constant 0 : index
    %c0_20 = arith.constant 0 : index
    %75 = vector.load %arg8[%c0_19, %c0_20] : memref<16x16xf32, #tpu.memory_space<vmem>>, vector<16x16xf32>
    %cst_21 = arith.constant dense<0.000000e+00> : vector<1x16xf32>
    %76 = tpu.matmul %74, %75, %cst_21 {dimension_numbers = #tpu.dot_dimension_numbers<[1], [0], [0], [1], [0, 0, 1, 1], [], []>} : vector<1x16xf32>, vector<16x16xf32>, vector<1x16xf32> -> vector<1x16xf32>
    %c0_22 = arith.constant 0 : index
    %c0_23 = arith.constant 0 : index
    %77 = vector.load %arg9[%c0_22, %c0_23] : memref<1x16xf32, #tpu.memory_space<vmem>>, vector<1x16xf32>
    %78 = arith.addf %76, %77 : vector<1x16xf32>
    %c0_24 = arith.constant 0 : index
    %c0_25 = arith.constant 0 : index
    %c0_26 = arith.constant 0 : index
    %79 = vector.load %arg10[%c0_24, %c0_25, %c0_26] : memref<1x1x16xf32, #tpu.memory_space<vmem>>, vector<1x1x16xf32>
    %80 = vector.shape_cast %79 : vector<1x1x16xf32> to vector<1x16xf32>
    %81 = vector.shape_cast %78 : vector<1x16xf32> to vector<1x1x16xf32>
    tpu.vector_store %arg10[%c0_24, %c0_25, %c0_26], %81 {strides = array<i32>} : memref<1x1x16xf32, #tpu.memory_space<vmem>>, vector<1x1x16xf32>,
    return
  }
  func.func @transform_0(%arg0: i32) -> (i32, i32, i32) {
    %c0_i32 = arith.constant 0 : i32
    %c0_i32_0 = arith.constant 0 : i32
    %c0_i32_1 = arith.constant 0 : i32
    return %arg0, %c0_i32, %c0_i32_0 : i32, i32, i32
  }
  func.func @transform_1(%arg0: i32) -> (i32, i32) {
    %c0_i32 = arith.constant 0 : i32
    %c0_i32_0 = arith.constant 0 : i32
    %c0_i32_1 = arith.constant 0 : i32
    return %c0_i32, %c0_i32_0 : i32, i32
  }
  func.func @transform_2(%arg0: i32) -> (i32, i32) {
    %c0_i32 = arith.constant 0 : i32
    %c0_i32_0 = arith.constant 0 : i32
    %c0_i32_1 = arith.constant 0 : i32
    return %c0_i32, %c0_i32_0 : i32, i32
  }
  func.func @transform_3(%arg0: i32) -> (i32, i32) {
    %c0_i32 = arith.constant 0 : i32
    %c0_i32_0 = arith.constant 0 : i32
    %c0_i32_1 = arith.constant 0 : i32
    return %c0_i32, %c0_i32_0 : i32, i32
  }
  func.func @transform_4(%arg0: i32) -> (i32, i32) {
    %c0_i32 = arith.constant 0 : i32
    %c0_i32_0 = arith.constant 0 : i32
    %c0_i32_1 = arith.constant 0 : i32
    return %c0_i32, %c0_i32_0 : i32, i32
  }
  func.func @transform_5(%arg0: i32) -> (i32, i32) {
    %c0_i32 = arith.constant 0 : i32
    %c0_i32_0 = arith.constant 0 : i32
    %c0_i32_1 = arith.constant 0 : i32
    return %c0_i32, %c0_i32_0 : i32, i32
  }
  func.func @transform_6(%arg0: i32) -> (i32, i32) {
    %c0_i32 = arith.constant 0 : i32
    %c0_i32_0 = arith.constant 0 : i32
    %c0_i32_1 = arith.constant 0 : i32
    return %c0_i32, %c0_i32_0 : i32, i32
  }
  func.func @transform_7(%arg0: i32) -> (i32, i32) {
    %c0_i32 = arith.constant 0 : i32
    %c0_i32_0 = arith.constant 0 : i32
    %c0_i32_1 = arith.constant 0 : i32
    return %c0_i32, %c0_i32_0 : i32, i32
  }
  func.func @transform_8(%arg0: i32) -> (i32, i32) {
    %c0_i32 = arith.constant 0 : i32
    %c0_i32_0 = arith.constant 0 : i32
    %c0_i32_1 = arith.constant 0 : i32
    return %c0_i32, %c0_i32_0 : i32, i32
  }
  func.func @transform_9(%arg0: i32) -> (i32, i32, i32) {
    %c0_i32 = arith.constant 0 : i32
    %c0_i32_0 = arith.constant 0 : i32
    %c0_i32_1 = arith.constant 0 : i32
    return %arg0, %c0_i32, %c0_i32_0 : i32, i32, i32
  }
}

</mosaic_0001>

<bundles_post_ra>
// kernel: tile.13
= control target key start
LH: loop header
LB: loop body
LE: loop exit
PB: predicated region body
PF: predicated region fallthrough
CT: control target
= control target key end

     0   :  { %s28_s0 = inlined_call_operand.vmem [shape: f32[4], index: 0, kind: input, shape index: {}]   ;;  %s29_s1 = inlined_call_operand.vmem [shape: f32[14,4], index: 1, kind: output, shape index: {}]  }
   0x1   :  { %v4_v0 = vld [vmem:[%s28_s0] ss:$0 sm:$0xff] }
   0x2   :  { %5 = vst [vmem:[%s29_s1] sm:$0xff] %v4_v0  ;;  %8 = vst [vmem:[%s29_s1 + $0x8] sm:$0xff] %v4_v0 }

// kernel: tile.14
= control target key start
LH: loop header
LB: loop body
LE: loop exit
PB: predicated region body
PF: predicated region fallthrough
CT: control target
= control target key end

     0   :  { %s115_s10 = smov 52   ;;  %s116_s11 = smov 44   ;;  %vm3_vm0 = vcmask 31744   ;;  %vm9_vm1 = vcmask 458144   ;;  %vm15_vm2 = vcmask 425344   ;;  %vm21_vm3 = vcmask 392544   ;;  %s183_s0 = inlined_call_operand.vmem [shape: f32[14,4], index: 0, kind: input, shape index: {}]   ;;  %s184_s1 = inlined_call_operand.vmem [shape: f32[1,56], index: 1, kind: output, shape index: {}]  }
   0x1   :  { %v89_v0 = vld [vmem:[%s183_s0 + $0xd] sm:$0x1]   ;;  %v91_v1 = vld [vmem:[%s183_s0 + $0xb] sm:$0x1]   ;;  %v90_v2 = vld [vmem:[%s183_s0 + $0xc] sm:$0x1]  }
   0x2   :  { %7 = vrot.lane.b32.xlu0 %v89_v0, %s115_s10  ;;  %19 = vrot.lane.b32.xlu1 %v91_v1, %s116_s11  ;;  %v92_v3 = vld [vmem:[%s183_s0 + $0xa] sm:$0x1]   ;;  %s117_s16 = smov 48   ;;  %s118_s17 = smov 40   ;;  %v93_v4 = vld [vmem:[%s183_s0 + $0x9] sm:$0x1]  }
   0x3   :  { %v94_v5 = vld [vmem:[%s183_s0 + $0x8] sm:$0x1]   ;;  %v2_v6 = vld [vmem:[%s183_s0] sm:$0x1]   ;;  %s119_s24 = smov 36   ;;  %s120_s25 = smov 32  }
   0x4   :  { %4 = vst.msk [vmem:[#allocation0] sm:$0x1] %vm3_vm0, %v2_v6   ;;  %v95_v7 = vld [vmem:[%s183_s0 + $0x7] sm:$0x1]   ;;  %v96_v8 = vld [vmem:[%s183_s0 + $0x6] sm:$0x1]  }
   0x5   :  { %s121_s30 = smov 28   ;;  %s122_s2 = smov 24   ;;  %v97_v9 = vld [vmem:[%s183_s0 + $0x5] sm:$0x1]   ;;  %v98_v10 = vld [vmem:[%s183_s0 + $0x4] sm:$0x1]  }
   0x6   :  { %13 = vrot.lane.b32.xlu0 %v90_v2, %s117_s16  ;;  %25 = vrot.lane.b32.xlu1 %v92_v3, %s118_s17  ;;  %s123_s7 = smov 20   ;;  %s124_s8 = smov 16   ;;  %v99_v11 = vld [vmem:[%s183_s0 + $0x3] sm:$0x1]   ;;  %v100_v12 = vld [vmem:[%s183_s0 + $0x2] sm:$0x1]  }
   0x7   :  { %s125_s13 = smov 12   ;;  %s126_s14 = smov 8   ;;  %v101_v13 = vld [vmem:[%s183_s0 + $0x1] sm:$0x1]   ;;  %vm27_vm4 = vcmask 359744   ;;  %vm33_vm5 = vcmask 326944  }
   0x8   :  { %s127_s0 = smov 4   ;;  %vm39_vm6 = vcmask 294144   ;;  %vm45_vm7 = vcmask 261344   ;;  %vm51_vm8 = vcmask 228544   ;;  %vm57_vm9 = vcmask 195744  }
   0x9   :  { %vm63_vm10 = vcmask 162944   ;;  %vm69_vm11 = vcmask 130144   ;;  %vm75_vm12 = vcmask 97344   ;;  %vm81_vm13 = vcmask 64544  }
   0xa   :  { %31 = vrot.lane.b32.xlu0 %v93_v4, %s119_s24  ;;  %37 = vrot.lane.b32.xlu1 %v94_v5, %s120_s25 }
   0xe   :  { %43 = vrot.lane.b32.xlu0 %v95_v7, %s121_s30  ;;  %49 = vrot.lane.b32.xlu1 %v96_v8, %s122_s2 }
  0x12   :  { %55 = vrot.lane.b32.xlu0 %v97_v9, %s123_s7  ;;  %61 = vrot.lane.b32.xlu1 %v98_v10, %s124_s8 }
  0x16   :  { %67 = vrot.lane.b32.xlu0 %v99_v11, %s125_s13  ;;  %73 = vrot.lane.b32.xlu1 %v100_v12, %s126_s14 }
  0x1a   :  { %79 = vrot.lane.b32.xlu0 %v101_v13, %s127_s0 }
  0x74   :  { %v8_v14 = vpop.permute.xlu0 %7   ;;  %v20_v15 = vpop.permute.xlu1 %19  }
  0x75   :  { %10 = vst.msk [vmem:[#allocation0] sm:$0x1] %vm9_vm1, %v8_v14  }
  0x78   :  { %v14_v16 = vpop.permute.xlu0 %13   ;;  %v26_v17 = vpop.permute.xlu1 %25  }
  0x79   :  { %16 = vst.msk [vmem:[#allocation0] sm:$0x1] %vm15_vm2, %v14_v16  }
  0x7a   :  { %22 = vst.msk [vmem:[#allocation0] sm:$0x1] %vm21_vm3, %v20_v15  }
  0x7b   :  { %28 = vst.msk [vmem:[#allocation0] sm:$0x1] %vm27_vm4, %v26_v17  }
  0x7c   :  { %v32_v18 = vpop.permute.xlu0 %31   ;;  %v38_v19 = vpop.permute.xlu1 %37  }
  0x7d   :  { %34 = vst.msk [vmem:[#allocation0] sm:$0x1] %vm33_vm5, %v32_v18  }
  0x7e   :  { %40 = vst.msk [vmem:[#allocation0] sm:$0x1] %vm39_vm6, %v38_v19  }
  0x80   :  { %v44_v20 = vpop.permute.xlu0 %43   ;;  %v50_v21 = vpop.permute.xlu1 %49  }
  0x81   :  { %46 = vst.msk [vmem:[#allocation0] sm:$0x1] %vm45_vm7, %v44_v20  }
  0x82   :  { %52 = vst.msk [vmem:[#allocation0] sm:$0x1] %vm51_vm8, %v50_v21  }
  0x84   :  { %v56_v22 = vpop.permute.xlu0 %55   ;;  %v62_v23 = vpop.permute.xlu1 %61  }
  0x85   :  { %58 = vst.msk [vmem:[#allocation0] sm:$0x1] %vm57_vm9, %v56_v22  }
  0x86   :  { %64 = vst.msk [vmem:[#allocation0] sm:$0x1] %vm63_vm10, %v62_v23  }
  0x88   :  { %v68_v24 = vpop.permute.xlu0 %67   ;;  %v74_v25 = vpop.permute.xlu1 %73  }
  0x89   :  { %70 = vst.msk [vmem:[#allocation0] sm:$0x1] %vm69_vm11, %v68_v24  }
  0x8a   :  { %76 = vst.msk [vmem:[#allocation0] sm:$0x1] %vm75_vm12, %v74_v25  }
  0x8c   :  { %v80_v26 = vpop.permute.xlu0 %79  }
  0x8d   :  { %82 = vst.msk [vmem:[#allocation0] sm:$0x1] %vm81_vm13, %v80_v26  }
  0x94   :  { %v86_v27 = vld [vmem:[#allocation0] sm:$0x1] }
  0x95   :  { %88 = vst [vmem:[%s184_s1] sm:$0x1] %v86_v27 }

// kernel: tile.18
= control target key start
LH: loop header
LB: loop body
LE: loop exit
PB: predicated region body
PF: predicated region fallthrough
CT: control target
= control target key end

     0   :  { %s28_s0 = inlined_call_operand.vmem [shape: f32[8], index: 0, kind: input, shape index: {}]   ;;  %s29_s1 = inlined_call_operand.vmem [shape: f32[12,8], index: 1, kind: output, shape index: {}]  }
   0x1   :  { %v4_v0 = vld [vmem:[%s28_s0] ss:$0 sm:$0xff] }
   0x2   :  { %5 = vst [vmem:[%s29_s1] sm:$0xff] %v4_v0  ;;  %8 = vst [vmem:[%s29_s1 + $0x8] sm:$0xff] %v4_v0 }

// kernel: tile.19
= control target key start
LH: loop header
LB: loop body
LE: loop exit
PB: predicated region body
PF: predicated region fallthrough
CT: control target
= control target key end

     0   :  { %s99_s10 = smov 88   ;;  %s100_s11 = smov 72   ;;  %vm3_vm0 = vcmask 64512   ;;  %vm9_vm1 = vcmask 786112   ;;  %vm15_vm2 = vcmask 720512   ;;  %vm21_vm3 = vcmask 654912   ;;  %s159_s0 = inlined_call_operand.vmem [shape: f32[12,8], index: 0, kind: input, shape index: {}]   ;;  %s160_s1 = inlined_call_operand.vmem [shape: f32[1,96], index: 1, kind: output, shape index: {}]  }
   0x1   :  { %v77_v0 = vld [vmem:[%s159_s0 + $0xb] sm:$0x1]   ;;  %v79_v1 = vld [vmem:[%s159_s0 + $0x9] sm:$0x1]   ;;  %v78_v2 = vld [vmem:[%s159_s0 + $0xa] sm:$0x1]  }
   0x2   :  { %7 = vrot.lane.b32.xlu0 %v77_v0, %s99_s10  ;;  %19 = vrot.lane.b32.xlu1 %v79_v1, %s100_s11  ;;  %v80_v3 = vld [vmem:[%s159_s0 + $0x8] sm:$0x1]   ;;  %s101_s16 = smov 80   ;;  %s102_s17 = smov 64   ;;  %v81_v4 = vld [vmem:[%s159_s0 + $0x7] sm:$0x1]  }
   0x3   :  { %v2_v5 = vld [vmem:[%s159_s0] sm:$0x1]   ;;  %v82_v6 = vld [vmem:[%s159_s0 + $0x6] sm:$0x1]   ;;  %s103_s24 = smov 56   ;;  %s104_s25 = smov 48  }
   0x4   :  { %4 = vst.msk [vmem:[#allocation0] sm:$0x1] %vm3_vm0, %v2_v5   ;;  %v83_v7 = vld [vmem:[%s159_s0 + $0x5] sm:$0x1]   ;;  %v84_v8 = vld [vmem:[%s159_s0 + $0x4] sm:$0x1]  }
   0x5   :  { %s105_s30 = smov 40   ;;  %s106_s2 = smov 32   ;;  %v85_v9 = vld [vmem:[%s159_s0 + $0x3] sm:$0x1]   ;;  %v86_v10 = vld [vmem:[%s159_s0 + $0x2] sm:$0x1]  }
   0x6   :  { %13 = vrot.lane.b32.xlu0 %v78_v2, %s101_s16  ;;  %25 = vrot.lane.b32.xlu1 %v80_v3, %s102_s17  ;;  %s107_s7 = smov 24   ;;  %s108_s8 = smov 16   ;;  %v87_v11 = vld [vmem:[%s159_s0 + $0x1] sm:$0x1]   ;;  %vm27_vm4 = vcmask 589312   ;;  %vm33_vm5 = vcmask 523712  }
   0x7   :  { %s109_s0 = smov 8   ;;  %vm39_vm6 = vcmask 458112   ;;  %vm45_vm7 = vcmask 392512   ;;  %vm51_vm8 = vcmask 326912   ;;  %vm57_vm9 = vcmask 261312  }
   0x8   :  { %vm63_vm10 = vcmask 195712   ;;  %vm69_vm11 = vcmask 130112  }
   0xa   :  { %31 = vrot.lane.b32.xlu0 %v81_v4, %s103_s24  ;;  %37 = vrot.lane.b32.xlu1 %v82_v6, %s104_s25 }
   0xe   :  { %43 = vrot.lane.b32.xlu0 %v83_v7, %s105_s30  ;;  %49 = vrot.lane.b32.xlu1 %v84_v8, %s106_s2 }
  0x12   :  { %55 = vrot.lane.b32.xlu0 %v85_v9, %s107_s7  ;;  %61 = vrot.lane.b32.xlu1 %v86_v10, %s108_s8 }
  0x16   :  { %67 = vrot.lane.b32.xlu0 %v87_v11, %s109_s0 }
  0x74   :  { %v8_v12 = vpop.permute.xlu0 %7   ;;  %v20_v13 = vpop.permute.xlu1 %19  }
  0x75   :  { %10 = vst.msk [vmem:[#allocation0] sm:$0x1] %vm9_vm1, %v8_v12  }
  0x78   :  { %v14_v14 = vpop.permute.xlu0 %13   ;;  %v26_v15 = vpop.permute.xlu1 %25  }
  0x79   :  { %16 = vst.msk [vmem:[#allocation0] sm:$0x1] %vm15_vm2, %v14_v14  }
  0x7a   :  { %22 = vst.msk [vmem:[#allocation0] sm:$0x1] %vm21_vm3, %v20_v13  }
  0x7b   :  { %28 = vst.msk [vmem:[#allocation0] sm:$0x1] %vm27_vm4, %v26_v15  }
  0x7c   :  { %v32_v16 = vpop.permute.xlu0 %31   ;;  %v38_v17 = vpop.permute.xlu1 %37  }
  0x7d   :  { %34 = vst.msk [vmem:[#allocation0] sm:$0x1] %vm33_vm5, %v32_v16  }
  0x7e   :  { %40 = vst.msk [vmem:[#allocation0] sm:$0x1] %vm39_vm6, %v38_v17  }
  0x80   :  { %v44_v18 = vpop.permute.xlu0 %43   ;;  %v50_v19 = vpop.permute.xlu1 %49  }
  0x81   :  { %46 = vst.msk [vmem:[#allocation0] sm:$0x1] %vm45_vm7, %v44_v18  }
  0x82   :  { %52 = vst.msk [vmem:[#allocation0] sm:$0x1] %vm51_vm8, %v50_v19  }
  0x84   :  { %v56_v20 = vpop.permute.xlu0 %55   ;;  %v62_v21 = vpop.permute.xlu1 %61  }
  0x85   :  { %58 = vst.msk [vmem:[#allocation0] sm:$0x1] %vm57_vm9, %v56_v20  }
  0x86   :  { %64 = vst.msk [vmem:[#allocation0] sm:$0x1] %vm63_vm10, %v62_v21  }
  0x88   :  { %v68_v22 = vpop.permute.xlu0 %67  }
  0x89   :  { %70 = vst.msk [vmem:[#allocation0] sm:$0x1] %vm69_vm11, %v68_v22  }
  0x90   :  { %v74_v23 = vld [vmem:[#allocation0] sm:$0x1] }
  0x91   :  { %76 = vst [vmem:[%s160_s1] sm:$0x1] %v74_v23 }

// kernel: alexnet_mini_forward.1
= control target key start
LH: loop header
LB: loop body
LE: loop exit
PB: predicated region body
PF: predicated region fallthrough
CT: control target
= control target key end

     0   :  { %14 = vsyncpa [#allocation3], 0  ;;  %s1815_s0 = inlined_call_operand.vmem [shape: f32[2,16,64], index: 0, kind: input, shape index: {}]   ;;  %s1816_s1 = inlined_call_operand.vmem [shape: f32[192,56], index: 1, kind: input, shape index: {}]   ;;  %s1817_s2 = inlined_call_operand.vmem [shape: f32[1,56], index: 2, kind: input, shape index: {}]   ;;  %s1818_s3 = inlined_call_operand.vmem [shape: f32[168,96], index: 3, kind: input, shape index: {}]   ;;  %s1819_s4 = inlined_call_operand.vmem [shape: f32[1,96], index: 4, kind: input, shape index: {}]   ;;  %s1820_s5 = inlined_call_operand.vmem [shape: f32[288,16], index: 5, kind: input, shape index: {}]   ;;  %s1821_s6 = inlined_call_operand.vmem [shape: f32[1,16], index: 6, kind: input, shape index: {}]   ;;  %s1822_s7 = inlined_call_operand.vmem [shape: f32[16,16], index: 7, kind: input, shape index: {}]   ;;  %s1823_s8 = inlined_call_operand.vmem [shape: f32[1,16], index: 8, kind: input, shape index: {}]   ;;  %s1824_s9 = inlined_call_operand.hbm [shape: f32[2,1,16], index: 9, kind: output, shape index: {}]  }
   0x1   :  { %16 = vsyncpa [#allocation3 + $0x1], 0  ;;  %s1377_s30 = smov 0   ;;  %s1379_s10 = smov 0  }
   0x2   :  { %s1381_s11 = smov 0   ;;  %s1383_s12 = smov 0  }
   0x3 LB: > { %s1398_s13 = sadd.s32 4294967295, %s1312_s12   ;;  %s1013_s14 = sadd.s32 4294967294, %s1312_s12   ;;  %s1312_s12 = sphi %s1383_s12, %s1834_s12   ;;  %s1308_s11 = sphi %s1381_s11, %s1833_s11   ;;  %s1304_s10 = sphi %s1379_s10, %s1832_s10   ;;  %s1300_s30 = sphi %s1377_s30, %s1831_s30  }
   0x4   : > { %s1402_s15 = sadd.s32 1, %s1312_s12   ;;  %s223_s16 = sadd.s32 1, %s1308_s11 }
   0x5   : > { %s220_s17 = ssub.s32 %s1312_s12, %s1402_s15  ;;  %p233_p0 = scmp.ne.s32.totalorder %s1308_s11, %s1304_s10 }
   0x6   : > { %p221_p1 = scmp.eq.s32.totalorder %s220_s17, 0  ;;  %p234_p2 = scmp.eq.s32.totalorder %s1398_s13, 1 }
   0x7   : > { %p239_p3 = scmp.ne.s32.totalorder %s1304_s10, %s1300_s30  ;;  %p240_p4 = scmp.eq.s32.totalorder %s1013_s14, 1 }
   0x8   : > { %s1413_s18 = scalar_select %p221_p1, %s1308_s11, %s223_s16  }
   0x9   : > { %p1415_p5 = por %p234_p2, %p233_p0  ;;  %p1419_p6 = por %p240_p4, %p239_p3 }
   0xa   : > { %p1016_p7 = scmp.ge.s32.totalorder %s1312_s12, 1  ;;  %p290_p8 = scmp.lt.s32.totalorder %s1312_s12, 3 }
   0xc   : > { %p291_p9 = pnand %p1016_p7, %p290_p8 }
   0xd   : > { %p325_p10 = scmp.lt.s32.totalorder (!%p291_p9), %s1398_s13, 1  ;;  %v332_v0 = vld [vmem:[%s1816_s1] sm:$0xff] (!%p291_p9)  ;;  %v333_v1 = vld [vmem:[%s1816_s1 + $0x8] sm:$0xff] (!%p291_p9)  ;;  %v1314_v2 = vmov (!%p291_p9), 0.0|0.0   ;;  %v334_v4 = vld [vmem:[%s1816_s1 + $0x10] sm:$0xff] (!%p291_p9)  ;;  %vm359_vm0 = vcmask (!%p291_p9), 1046528  }
   0xe   : > { %294 = sbr.rel (%p291_p9) target bundleno = 1533 (0x5fd), region = 56  ;;  %1092 = vmatprep.subr.bf16.mxu0 (!%p291_p9), %v1314_v2  ;;  %v1093_v3 = vpack.c.bf16 (!%p291_p9), %v333_v1, %v332_v0  ;;  %v335_v5 = vld [vmem:[%s1816_s1 + $0x18] sm:$0xff] (!%p291_p9)  ;;  %1128 = vmatprep.subr.bf16.mxu1 (!%p291_p9), %v1314_v2  ;;  %v336_v7 = vld [vmem:[%s1816_s1 + $0x20] sm:$0xff] (!%p291_p9)  ;;  %v337_v8 = vld [vmem:[%s1816_s1 + $0x28] sm:$0xff] (!%p291_p9)  ;;  %vm369_vm1 = vcmask (!%p291_p9), 1045504   ;;  %vm373_vm2 = vcmask (!%p291_p9), 523264  }
   0xf   : > { %v1096_v6 = vpack.c.bf16 (!%p291_p9), %v335_v5, %v334_v4  ;;  %v1099_v13 = vpack.c.bf16 (!%p291_p9), %v337_v8, %v336_v7  ;;  %v338_v15 = vld [vmem:[%s1816_s1 + $0x30] sm:$0xff] (!%p291_p9)  ;;  %v339_v16 = vld [vmem:[%s1816_s1 + $0x38] sm:$0xff] (!%p291_p9)  ;;  %v340_v21 = vld [vmem:[%s1816_s1 + $0x40] sm:$0xff] (!%p291_p9)  ;;  %s1825_s16 = smov (!%p291_p9), 112   ;;  %vm505_vm3 = vcmask (!%p291_p9), 457728   ;;  %vm517_vm4 = vcmask (!%p291_p9), 326656  }
  0x10   : > { %1094 = vmatpush1.bf16.msra.mxu0 (!%p291_p9), %v1093_v3  ;;  %v1102_v20 = vpack.c.bf16 (!%p291_p9), %v339_v16, %v338_v15  ;;  %v341_v22 = vld [vmem:[%s1816_s1 + $0x48] sm:$0xff] (!%p291_p9)  ;;  %v342_v24 = vld [vmem:[%s1816_s1 + $0x50] sm:$0xff] (!%p291_p9)  ;;  %v343_v25 = vld [vmem:[%s1816_s1 + $0x58] sm:$0xff] (!%p291_p9)  ;;  %vm508_vm5 = vcmask (!%p291_p9), 916480   ;;  %vm619_vm6 = vcmask (!%p291_p9), 1040384   ;;  %vm621_vm7 = vcmask (!%p291_p9), 1041408  }
  0x11   : > { %1095 = vmatprep.subr.bf16.mxu0 (!%p291_p9), %v1314_v2  ;;  %v1105_v23 = vpack.c.bf16 (!%p291_p9), %v341_v22, %v340_v21  ;;  %v1108_v26 = vpack.c.bf16 (!%p291_p9), %v343_v25, %v342_v24  ;;  %v344_v27 = vld [vmem:[%s1816_s1 + $0x60] sm:$0xff] (!%p291_p9)  ;;  %v345_v28 = vld [vmem:[%s1816_s1 + $0x68] sm:$0xff] (!%p291_p9)  ;;  %v346_v30 = vld [vmem:[%s1816_s1 + $0x70] sm:$0xff] (!%p291_p9)  ;;  %vm623_vm8 = vcmask (!%p291_p9), 1042432   ;;  %vm625_vm9 = vcmask (!%p291_p9), 1043456   ;;  %s1319_s22 = smov (!%p291_p9), 120  }
  0x12   : > { %v1111_v29 = vpack.c.bf16 (!%p291_p9), %v345_v28, %v344_v27  ;;  %v347_v31 = vld [vmem:[%s1816_s1 + $0x78] sm:$0xff] (!%p291_p9)  ;;  %v348_v33 = vld [vmem:[%s1816_s1 + $0x80] sm:$0xff] (!%p291_p9)  ;;  %v349_v34 = vld [vmem:[%s1816_s1 + $0x88] sm:$0xff] (!%p291_p9)  ;;  %vm627_vm10 = vcmask (!%p291_p9), 1044480   ;;  %s1320_s23 = smov (!%p291_p9), 96   ;;  %s1321_s24 = smov (!%p291_p9), 104  }
  0x13   : > { %v1114_v32 = vpack.c.bf16 (!%p291_p9), %v347_v31, %v346_v30  ;;  %v1117_v35 = vpack.c.bf16 (!%p291_p9), %v349_v34, %v348_v33  ;;  %v350_v36 = vld [vmem:[%s1816_s1 + $0x90] sm:$0xff] (!%p291_p9)  ;;  %v351_v37 = vld [vmem:[%s1816_s1 + $0x98] sm:$0xff] (!%p291_p9)  ;;  %v352_v39 = vld [vmem:[%s1816_s1 + $0xa0] sm:$0xff] (!%p291_p9)  ;;  %s1322_s26 = smov (!%p291_p9), 88   ;;  %vm650_vm11 = vcmask (!%p291_p9), 64512   ;;  %vm652_vm12 = vcmask (!%p291_p9), 130048  }
  0x14   : > { %1097 = vmatpush1.bf16.msra.mxu0 (!%p291_p9), %v1096_v6  ;;  %v1120_v38 = vpack.c.bf16 (!%p291_p9), %v351_v37, %v350_v36  ;;  %v353_v40 = vld [vmem:[%s1816_s1 + $0xa8] sm:$0xff] (!%p291_p9)  ;;  %v354_v42 = vld [vmem:[%s1816_s1 + $0xb0] sm:$0xff] (!%p291_p9)  ;;  %v355_v43 = vld [vmem:[%s1816_s1 + $0xb8] sm:$0xff] (!%p291_p9)  ;;  %vm654_vm13 = vcmask (!%p291_p9), 195584   ;;  %vm656_vm14 = vcmask (!%p291_p9), 261120   ;;  %vm1323_vm15 = vmmov (!%p291_p9), 0  }
  0x15   : > { %s326_s29 = scalar_select %p325_p10, %s1398_s13, 1  ;;  %1098 = vmatprep.subr.bf16.mxu0 %v1314_v2  ;;  %v1123_v41 = vpack.c.bf16 %v353_v40, %v352_v39  ;;  %v1126_v44 = vpack.c.bf16 %v355_v43, %v354_v42  ;;  %v463_v49 = vld [vmem:[%s1818_s3] sm:$0xff]  ;;  %v464_v50 = vld [vmem:[%s1818_s3 + $0x8] sm:$0xff]  ;;  %v465_v51 = vld [vmem:[%s1818_s3 + $0x10] sm:$0xff] }
  0x16   : > { %v1129_v52 = vpack.c.bf16 %v464_v50, %v463_v49  ;;  %v466_v53 = vld [vmem:[%s1818_s3 + $0x18] sm:$0xff]  ;;  %v467_v55 = vld [vmem:[%s1818_s3 + $0x20] sm:$0xff]  ;;  %v468_v56 = vld [vmem:[%s1818_s3 + $0x28] sm:$0xff]  ;;  %s323_s17 = sand.u32 1, %s1304_s10  }
  0x17   : > { %s1030_s14 = sshll.u32 %s326_s29, 4  ;;  %v1132_v54 = vpack.c.bf16 %v466_v53, %v465_v51  ;;  %v1135_v57 = vpack.c.bf16 %v468_v56, %v467_v55  ;;  %v469_v58 = vld [vmem:[%s1818_s3 + $0x30] sm:$0xff]  ;;  %v470_v59 = vld [vmem:[%s1818_s3 + $0x38] sm:$0xff]  ;;  %v471_v61 = vld [vmem:[%s1818_s3 + $0x40] sm:$0xff]  ;;  %s1317_s29 = smov 56  }
  0x18   : > { %s329_s25 = scalar_lea.vmem %s1815_s0, %s1030_s14  ;;  %s1826_s14 = smov 64   ;;  %1100 = vmatpush1.bf16.msra.mxu0 %v1099_v13  ;;  %1130 = vmatpush1.bf16.msra.mxu1 %v1129_v52  ;;  %v1138_v60 = vpack.c.bf16 %v470_v59, %v469_v58  ;;  %v472_v62 = vld [vmem:[%s1818_s3 + $0x48] sm:$0xff]  ;;  %v473_v0 = vld [vmem:[%s1818_s3 + $0x50] sm:$0xff]  ;;  %v474_v1 = vld [vmem:[%s1818_s3 + $0x58] sm:$0xff] }
  0x19   : > { %v1451_v9 = vld [vmem:[%s329_s25] sm:$0xff]  ;;  %v1453_v10 = vld [vmem:[%s329_s25 + $0x8] sm:$0xff]  ;;  %1101 = vmatprep.subr.bf16.mxu0 %v1314_v2  ;;  %1131 = vmatprep.subr.bf16.mxu1 %v1314_v2  ;;  %v1141_v63 = vpack.c.bf16 %v472_v62, %v471_v61  ;;  %v1144_v3 = vpack.c.bf16 %v474_v1, %v473_v0  ;;  %v477_v7 = vld [vmem:[%s1818_s3 + $0x70] sm:$0xff]  ;;  %s946_s27 = scalar_lea.sflag [#allocation3], %s323_s17 }
  0x1a   : > { %v360_v11 = vrot.slane %v1451_v9, 1  ;;  %v361_v12 = vrot.slane %v1453_v10, 1  ;;  %v370_v14 = vrot.slane %v1451_v9, 2  ;;  %v371_v17 = vrot.slane %v1453_v10, 2  ;;  %v475_v4 = vld [vmem:[%s1818_s3 + $0x60] sm:$0xff]  ;;  %v476_v5 = vld [vmem:[%s1818_s3 + $0x68] sm:$0xff] }
  0x1b   : > { %v1147_v6 = vpack.c.bf16 %v476_v5, %v475_v4  ;;  %v478_v8 = vld [vmem:[%s1818_s3 + $0x78] sm:$0xff]  ;;  %v481_v13 = vld [vmem:[%s1818_s3 + $0x90] sm:$0xff]  ;;  %v1019_v16 = vld [vmem:[%s1817_s2] ss:$0 sm:$0xff] }
  0x1c   : > { %v362_v18 = vsel %vm359_vm0, %v360_v11, %v361_v12  ;;  %v372_v19 = vsel %vm369_vm1, %v370_v14, %v371_v17  ;;  %1103 = vmatpush1.bf16.msra.mxu0 %v1102_v20  ;;  %1133 = vmatpush1.bf16.msra.mxu1 %v1132_v54  ;;  %v480_v11 = vld [vmem:[%s1818_s3 + $0x88] sm:$0xff]  ;;  %v482_v14 = vld [vmem:[%s1818_s3 + $0x98] sm:$0xff]  ;;  %v483_v21 = vld [vmem:[%s1818_s3 + $0xa0] sm:$0xff] }
  0x1d   : > { %363 = vrot.lane.b32.xlu0 %v362_v18, %s1826_s14  ;;  %1020 = vmatprep.mubr.msk.f32.mxu0 %vm373_vm2, %v372_v19  ;;  %v1156_v15 = vpack.c.bf16 %v482_v14, %v481_v13  ;;  %v1316_v18 = vmov 0.0   ;;  %v704_v4 = vld [vmem:[%s1820_s5 + $0x88] sm:$0xff]  ;;  %v687_v5 = vld [vmem:[%s1820_s5] sm:$0xff]  ;;  %v690_v13 = vld [vmem:[%s1820_s5 + $0x18] sm:$0xff] }
  0x1e   : > { %1104 = vmatprep.subr.bf16.mxu0 %v1314_v2  ;;  %1134 = vmatprep.subr.bf16.mxu1 %v1314_v2  ;;  %v707_v14 = vld [vmem:[%s1820_s5 + $0xa0] sm:$0xff] }
  0x20   : > { %1106 = vmatpush1.bf16.msra.mxu0 %v1105_v23  ;;  %1136 = vmatpush1.bf16.msra.mxu1 %v1135_v57 }
  0x21   : > { %365 = vrot.lane.b32.xlu0 %v361_v12, %s1826_s14  ;;  %1107 = vmatprep.subr.bf16.mxu0 %v1314_v2  ;;  %s1324_s14 = smov 16  }
  0x22   : > { %1137 = vmatprep.subr.bf16.mxu1 %v1314_v2 }
  0x24   : > { %1109 = vmatpush1.bf16.msra.mxu0 %v1108_v26  ;;  %1139 = vmatpush1.bf16.msra.mxu1 %v1138_v60 }
  0x25   : > { %1110 = vmatprep.subr.bf16.mxu0 %v1314_v2  ;;  %1140 = vmatprep.subr.bf16.mxu1 %v1314_v2 }
  0x28   : > { %1112 = vmatpush1.bf16.msra.mxu0 %v1111_v29  ;;  %1142 = vmatpush1.bf16.msra.mxu1 %v1141_v63 }
  0x29   : > { %1113 = vmatprep.subr.bf16.mxu0 %v1314_v2  ;;  %1143 = vmatprep.subr.bf16.mxu1 %v1314_v2 }
  0x2c   : > { %1115 = vmatpush1.bf16.msra.mxu0 %v1114_v32  ;;  %1145 = vmatpush1.bf16.msra.mxu1 %v1144_v3  ;;  %v703_v3 = vld [vmem:[%s1820_s5 + $0x80] sm:$0xff] }
  0x2d   : > { %1116 = vmatprep.subr.bf16.mxu0 %v1314_v2  ;;  %1146 = vmatprep.subr.bf16.mxu1 %v1314_v2 }
  0x30   : > { %1118 = vmatpush1.bf16.msra.mxu0 %v1117_v35  ;;  %1148 = vmatpush1.bf16.msra.mxu1 %v1147_v6  ;;  %v1158_v6 = vpack.c.bf16 %v704_v4, %v703_v3 }
  0x31   : > { %1119 = vmatprep.subr.bf16.mxu0 %v1314_v2  ;;  %1149 = vmatprep.subr.bf16.mxu1 %v1314_v2 }
  0x34   : > { %1121 = vmatpush1.bf16.msra.mxu0 %v1120_v38 }
  0x35   : > { %1122 = vmatprep.subr.bf16.mxu0 %v1314_v2 }
  0x38   : > { %1124 = vmatpush1.bf16.msra.mxu0 %v1123_v41  ;;  %v1022_v41 = vld [vmem:[%s1819_s4] ss:$0 sm:$0xff] }
  0x39   : > { %1125 = vmatprep.subr.bf16.mxu0 %v1314_v2 }
  0x3c   : > { %1127 = vmatpush1.bf16.msra.mxu0 %v1126_v44 }
  0x3d   : > { %1190 = vmatprep.subr.bf16.mxu0 %v1314_v2 }
  0x8f   : > { %v364_v45 = vpop.permute.xlu0 %363 }
  0x90   : > { %v374_v46 = vsel %vm373_vm2, %v1451_v9, %v364_v45  ;;  %v1150_v9 = vpack.c.bf16 %v478_v8, %v477_v7  ;;  %v688_v7 = vld [vmem:[%s1820_s5 + $0x8] sm:$0xff]  ;;  %v705_v8 = vld [vmem:[%s1820_s5 + $0x90] sm:$0xff] }
  0x91   : > { %451 = vmatmul.mubr.f32.vlgmr.msra.gmra.mrb[0].mxu0 %v374_v46 }
  0x92   : > { %1021 = vmatprep.mubr.msk.f32.mxu0 %vm373_vm2, %v371_v17  ;;  %1151 = vmatpush1.bf16.msra.mxu1 %v1150_v9  ;;  %v706_v9 = vld [vmem:[%s1820_s5 + $0x98] sm:$0xff] }
  0x93   : > { %v366_v47 = vpop.permute.xlu0 %365  ;;  %1152 = vmatprep.subr.bf16.mxu1 %v1314_v2 }
  0x94   : > { %v375_v48 = vsel %vm373_vm2, %v1453_v10, %v366_v47  ;;  %v479_v10 = vld [vmem:[%s1818_s3 + $0x80] sm:$0xff] }
  0x95   : > { %456 = vmatmul.mubr.f32.gmra.mrb[2].mxu0 %v375_v48  ;;  %v1153_v12 = vpack.c.bf16 %v480_v11, %v479_v10  ;;  %v1160_v10 = vpack.c.bf16 %v688_v7, %v687_v5  ;;  %v1162_v11 = vpack.c.bf16 %v706_v9, %v705_v8 }
  0x96   : > { %1082 = vmatprep.mubr.msk.f32.mxu0 %vm1323_vm15, %v1316_v18 }
  0x97   : > { %1154 = vmatpush1.bf16.msra.mxu1 %v1153_v12  ;;  %v689_v12 = vld [vmem:[%s1820_s5 + $0x10] sm:$0xff] }
  0x98   : > { %1155 = vmatprep.subr.bf16.mxu1 %v1314_v2 }
  0x9b   : > { %1157 = vmatpush1.bf16.msra.mxu1 %v1156_v15  ;;  %v708_v15 = vld [vmem:[%s1820_s5 + $0xa8] sm:$0xff] }
  0x9c   : > { %562 = vmatprep.subr.mxu1 %v1316_v18 }
  0x9f   : > { %563 = vmatpush1.msra.mxu1 %v483_v21  ;;  %v709_v21 = vld [vmem:[%s1820_s5 + $0xb0] sm:$0xff] }
  0xa0   : > { %1159 = vmatprep.subr.bf16.mxu1 %v1158_v6 }
 0x164   : > { %v452_v17 = vpop.f32.mrb[0].mxu0 }
 0x165   : > { %v453_v19 = vadd.f32 %v1019_v16, %v452_v17  ;;  %v454_v20 = vpop.f32.mrb[1].mxu0  ;;  %v1166_v17 = vpack.c.bf16 %v708_v15, %v707_v14 }
 0x166   : > { %v692_v20 = vld [vmem:[%s1820_s5 + $0x28] sm:$0xff] }
 0x167   : > { %v461_v23 = vmax.f32 %v453_v19, 0.0  ;;  %v691_v19 = vld [vmem:[%s1820_s5 + $0x20] sm:$0xff] }
 0x168   : > { %v457_v22 = vpop.f32.mrb[2].mxu0 }
 0x169   : > { %v458_v24 = vadd.f32 %v1019_v16, %v457_v22  ;;  %v459_v25 = vpop.f32.mrb[3].mxu0  ;;  %v487_v28 = vrot.slane %v461_v23, 1  ;;  %v496_v31 = vrot.slane %v461_v23, 2  ;;  %v1164_v16 = vpack.c.bf16 %v690_v13, %v689_v12  ;;  %v710_v22 = vld [vmem:[%s1820_s5 + $0xb8] sm:$0xff] }
 0x16a   : > { %v693_v25 = vld [vmem:[%s1820_s5 + $0x30] sm:$0xff] }
 0x16b   : > { %v462_v26 = vmax.f32 %v458_v24, 0.0  ;;  %v1170_v24 = vpack.c.bf16 %v710_v22, %v709_v21  ;;  %v868_v21 = vld [vmem:[%s1822_s7 + $0x8] sm:$0xff] }
 0x16d   : > { %v488_v27 = vrot.slane %v462_v26, 1  ;;  %v497_v29 = vrot.slane %v462_v26, 2 }
 0x16f   : > { %492 = vrot.lane.b32.xlu0 %v488_v27, %s1317_s29  ;;  %v489_v30 = vsel %vm359_vm0, %v487_v28, %v488_v27  ;;  %v498_v32 = vsel %vm369_vm1, %v496_v31, %v497_v29  ;;  %v711_v27 = vld [vmem:[%s1820_s5 + $0xc0] sm:$0xff]  ;;  %v712_v28 = vld [vmem:[%s1820_s5 + $0xc8] sm:$0xff]  ;;  %vm680_vm0 = vcmask 392192   ;;  %vm682_vm1 = vcmask 785408  }
 0x170   : > { %490 = vrot.lane.b32.xlu1 %v489_v30, %s1317_s29  ;;  %v1174_v30 = vpack.c.bf16 %v712_v28, %v711_v27  ;;  %v695_v31 = vld [vmem:[%s1820_s5 + $0x40] sm:$0xff] }
 0x174   : > { %499 = vrot.lane.b32.xlu1 %v498_v32, %s1825_s16  ;;  %v696_v32 = vld [vmem:[%s1820_s5 + $0x48] sm:$0xff] }
 0x178   : > { %501 = vrot.lane.b32.xlu1 %v497_v29, %s1825_s16 }
 0x1e1   : > { %v493_v36 = vpop.permute.xlu0 %492 }
 0x1e2   : > { %v491_v33 = vpop.permute.xlu1 %490  ;;  %v507_v38 = vsel %vm505_vm3, %v462_v26, %v493_v36  ;;  %v694_v26 = vld [vmem:[%s1820_s5 + $0x38] sm:$0xff] }
 0x1e3   : > { %v506_v34 = vsel %vm505_vm3, %v461_v23, %v491_v33  ;;  %v1168_v23 = vpack.c.bf16 %v692_v20, %v691_v19  ;;  %v1172_v29 = vpack.c.bf16 %v694_v26, %v693_v25  ;;  %v713_v33 = vld [vmem:[%s1820_s5 + $0xd0] sm:$0xff]  ;;  %v867_v20 = vld [vmem:[%s1822_s7] sm:$0xff] }
 0x1e4   : > { %v1197_v22 = vpack.c.bf16 %v868_v21, %v867_v20 }
 0x1e6   : > { %v500_v35 = vpop.permute.xlu1 %499 }
 0x1e7   : > { %1023 = vmatprep.mubr.msk.f32.mxu1 %vm517_vm4, %v500_v35  ;;  %v509_v37 = vsel %vm508_vm5, %v506_v34, %v500_v35  ;;  %v714_v34 = vld [vmem:[%s1820_s5 + $0xd8] sm:$0xff]  ;;  %v1176_v35 = vpack.c.bf16 %v696_v32, %v695_v31  ;;  %v869_v31 = vld [vmem:[%s1823_s8] sm:$0x1] }
 0x1e8   : > { %587 = vmatmul.mubr.f32.vlgmr.msra.gmra.mrb[0].mxu1 %v509_v37  ;;  %v1178_v36 = vpack.c.bf16 %v714_v34, %v713_v33  ;;  %v697_v37 = vld [vmem:[%s1820_s5 + $0x50] sm:$0xff] }
 0x1e9   : > { %1161 = vmatpush3.bf16.msra.mxu1 %v1160_v10 }
 0x1ea   : > { %v502_v39 = vpop.permute.xlu1 %501  ;;  %1163 = vmatprep.subr.bf16.mxu1 %v1162_v11 }
 0x1eb   : > { %1024 = vmatprep.mubr.msk.f32.mxu1 %vm517_vm4, %v502_v39  ;;  %v510_v40 = vsel %vm508_vm5, %v507_v38, %v502_v39  ;;  %v698_v38 = vld [vmem:[%s1820_s5 + $0x58] sm:$0xff] }
 0x1ec   : > { %592 = vmatmul.mubr.f32.gmra.mrb[2].mxu1 %v510_v40  ;;  %v1180_v39 = vpack.c.bf16 %v698_v38, %v697_v37  ;;  %v719_v40 = vld [vmem:[%s1820_s5 + $0x100] sm:$0xff] }
 0x1ed   : > { %1165 = vmatpush3.bf16.msra.mxu1 %v1164_v16 }
 0x1ee   : > { %1167 = vmatprep.subr.bf16.mxu1 %v1166_v17 }
 0x1f1   : > { %1169 = vmatpush3.bf16.msra.mxu1 %v1168_v23 }
 0x1f2   : > { %1171 = vmatprep.subr.bf16.mxu1 %v1170_v24 }
 0x1f5   : > { %1173 = vmatpush3.bf16.msra.mxu1 %v1172_v29 }
 0x1f6   : > { %1175 = vmatprep.subr.bf16.mxu1 %v1174_v30 }
 0x1f9   : > { %1177 = vmatpush3.bf16.msra.mxu1 %v1176_v35 }
 0x1fa   : > { %1179 = vmatprep.subr.bf16.mxu1 %v1178_v36 }
 0x1fd   : > { %1181 = vmatpush3.bf16.msra.mxu1 %v1180_v39 }
 0x2bb   : > { %v588_v42 = vpop.f32.mrb[0].mxu1 }
 0x2bc   : > { %v589_v43 = vadd.f32 %v1022_v41, %v588_v42  ;;  %v590_v44 = vpop.f32.mrb[1].mxu1 }
 0x2bd   : > { %v716_v44 = vld [vmem:[%s1820_s5 + $0xe8] sm:$0xff] }
 0x2be   : > { %v597_v45 = vmax.f32 %v589_v43, 0.0  ;;  %v715_v43 = vld [vmem:[%s1820_s5 + $0xe0] sm:$0xff] }
 0x2bf   : > { %v593_v46 = vpop.f32.mrb[2].mxu1 }
 0x2c0   : > { %v600_v47 = vrot.slane %v597_v45, 1  ;;  %v594_v48 = vadd.f32 %v1022_v41, %v593_v46  ;;  %v595_v49 = vpop.f32.mrb[3].mxu1  ;;  %v720_v41 = vld [vmem:[%s1820_s5 + $0x108] sm:$0xff] }
 0x2c1   : > { %v1191_v42 = vpack.c.bf16 %v720_v41, %v719_v40  ;;  %v700_v49 = vld [vmem:[%s1820_s5 + $0x68] sm:$0xff] }
 0x2c2   : > { %v602_v50 = vmax.f32 %v597_v45, %v600_v47  ;;  %v598_v51 = vmax.f32 %v594_v48, 0.0  ;;  %v699_v45 = vld [vmem:[%s1820_s5 + $0x60] sm:$0xff]  ;;  %v1182_v48 = vpack.c.bf16 %v716_v44, %v715_v43 }
 0x2c3   : > { %1192 = vmatpush3.bf16.msra.mxu0 %v1191_v42 }
 0x2c4   : > { %v608_v52 = vrot.slane %v602_v50, 1  ;;  %v610_v53 = vrot.slane %v602_v50, 2  ;;  %v604_v54 = vrot.slane %v598_v51, 1  ;;  %v612_v56 = vrot.slane %v602_v50, 3  ;;  %1183 = vmatprep.subr.bf16.mxu1 %v1182_v48  ;;  %1193 = vmatprep.subr.bf16.mxu0 %v1314_v2 }
 0x2c6   : > { %v606_v55 = vmax.f32 %v598_v51, %v604_v54  ;;  %v620_v57 = vsel %vm619_vm6, %v602_v50, %v608_v52  ;;  %v1184_v51 = vpack.c.bf16 %v700_v49, %v699_v45  ;;  %v721_v52 = vld [vmem:[%s1820_s5 + $0x110] sm:$0xff] }
 0x2c7   : > { %v622_v58 = vsel %vm621_vm7, %v620_v57, %v610_v53  ;;  %v722_v53 = vld [vmem:[%s1820_s5 + $0x118] sm:$0xff] }
 0x2c8   : > { %v615_v59 = vrot.slane %v606_v55, 4  ;;  %v617_v60 = vrot.slane %v606_v55, 5  ;;  %v624_v61 = vsel %vm623_vm8, %v622_v58, %v612_v56  ;;  %1185 = vmatpush3.bf16.msra.mxu1 %v1184_v51  ;;  %v1194_v54 = vpack.c.bf16 %v722_v53, %v721_v52  ;;  %v717_v55 = vld [vmem:[%s1820_s5 + $0xf0] sm:$0xff]  ;;  %v718_v56 = vld [vmem:[%s1820_s5 + $0xf8] sm:$0xff] }
 0x2ca   : > { %v626_v62 = vsel %vm625_vm9, %v624_v61, %v615_v59  ;;  %v1186_v59 = vpack.c.bf16 %v718_v56, %v717_v55  ;;  %v702_v61 = vld [vmem:[%s1820_s5 + $0x78] sm:$0xff]  ;;  %1195 = vmatpush3.bf16.msra.mxu0 %v1194_v54 }
 0x2cb   : > { %v628_v63 = vsel %vm627_vm10, %v626_v62, %v617_v60  ;;  %v701_v60 = vld [vmem:[%s1820_s5 + $0x70] sm:$0xff]  ;;  %1196 = vmatprep.subr.bf16.mxu0 %v1314_v2 }
 0x2cc   : > { %630 = vrot.lane.b32.xlu0 %v628_v63, %s1319_s22  ;;  %1187 = vmatprep.subr.bf16.mxu1 %v1186_v59 }
 0x33e   : > { %v631_v0 = vpop.permute.xlu0 %630 }
 0x33f   : > { %v1621_v1 = vmax.f32 %v628_v63, %v631_v0  ;;  %v1188_v0 = vpack.c.bf16 %v702_v61, %v701_v60 }
 0x341   : > { %638 = vrot.lane.b32.xlu0 %v1621_v1, %s1825_s16  ;;  %635 = vrot.lane.b32.xlu1 %v1621_v1, %s1319_s22  ;;  %s1829_s16 = smov 64   ;;  %s1325_s22 = smov 48  }
 0x342   : > { %1189 = vmatpush3.bf16.msra.mxu1 %v1188_v0 }
 0x345   : > { %644 = vrot.lane.b32.xlu0 %v1621_v1, %s1320_s23  ;;  %641 = vrot.lane.b32.xlu1 %v1621_v1, %s1321_s24  ;;  %s1830_s24 = smov 112  }
 0x349   : > { %647 = vrot.lane.b32.xlu1 %v1621_v1, %s1322_s26 }
 0x3b3   : > { %v639_v46 = vpop.permute.xlu0 %638  ;;  %v636_v47 = vpop.permute.xlu1 %635 }
 0x3b4   : > { %v651_v50 = vsel %vm650_vm11, %v1621_v1, %v636_v47 }
 0x3b5   : > { %v653_v57 = vsel %vm652_vm12, %v651_v50, %v639_v46 }
 0x3b7   : > { %v642_v58 = vpop.permute.xlu1 %641  ;;  %v645_v62 = vpop.permute.xlu0 %644 }
 0x3b8   : > { %v655_v63 = vsel %vm654_vm13, %v653_v57, %v642_v58 }
 0x3b9   : > { %v657_v1 = vsel %vm656_vm14, %v655_v63, %v645_v62 }
 0x3bb   : > { %v648_v3 = vpop.permute.xlu1 %647 }
 0x3bc   : > { %v658_v4 = vsel %vm517_vm4, %v657_v1, %v648_v3 }
 0x3bd   : > { %v668_v5 = vrot.slane %v658_v4, 3  ;;  %v664_v6 = vrot.slane %v658_v4, 2  ;;  %v672_v7 = vrot.slane %v658_v4, 4  ;;  %v660_v8 = vrot.slane %v658_v4, 1 }
 0x3be   : > { %v676_v9 = vrot.slane %v658_v4, 5 }
 0x3bf   : > { %669 = vrot.lane.b32.xlu1 %v668_v5, %s1324_s14  ;;  %665 = vrot.lane.b32.xlu0 %v664_v6, %s1320_s23 }
 0x3c3   : > { %673 = vrot.lane.b32.xlu0 %v672_v7, %s1829_s16  ;;  %661 = vrot.lane.b32.xlu1 %v660_v8, %s1325_s22  ;;  %s1027_s16 = sshll.u32 %s1398_s13, 4  ;;  %s324_s22 = scalar_lea.vmem [#allocation2], %s323_s17 }
 0x3c4   : > { %s1773_s26 = scalar_lea.hbm %s1824_s9, %s1027_s16  ;;  %s1326_s13 = smov [#allocation2]  }
 0x3c5   : > { %s1254_s29 = sshll.u32 %s1326_s13, 4  ;;  %s1255_s29 = int_to_ptr.vmem [resolvable:$false] %s1254_s29 }
 0x3c6   : > { %s1256_s21 = scalar_lea.vmem %s1255_s29, 32 }
 0x3c7   : > { %677 = vrot.lane.b32.xlu0 %v676_v9, %s1830_s24  ;;  %s958_s24 = sshll.u32 %s324_s22, 4  ;;  %s1775_s24 = int_to_ptr.vmem [resolvable:$true] %s958_s24 }
 0x3c8   : > { %s1250_s28 = scalar_lea.vmem %s1775_s24, 16  ;;  %p1257_p0 = scmp.lt.s32.totalorder %s1775_s24, %s1255_s29 }
 0x3c9   : > { %p1251_p11 = scmp.ne.s32.totalorder %s1775_s24, %s1250_s28  ;;  %p1258_p1 = scmp.lt.s32.totalorder %s1256_s21, %s1250_s28 }
 0x3cb   : > { %p1252_p12 = pnand %p1251_p11, %p1415_p5  ;;  %p1259_p2 = por %p1258_p1, %p1257_p0 }
 0x3cd   : > { %p1253_p13 = pneg %p1252_p12 }
 0x3cf   : > { %p1260_p3 = pnand %p1259_p2, %p1253_p13 }
 0x431   : > { %v670_v2 = vpop.permute.xlu1 %669  ;;  %v666_v10 = vpop.permute.xlu0 %665 }
 0x432   : > { %v684_v13 = vsel %vm652_vm12, %v666_v10, %v670_v2 }
 0x435   : > { %v674_v11 = vpop.permute.xlu0 %673  ;;  %v662_v12 = vpop.permute.xlu1 %661 }
 0x436   : > { %v681_v14 = vsel %vm680_vm0, %v658_v4, %v662_v12  ;;  %v685_v15 = vsel %vm373_vm2, %v684_v13, %v674_v11  ;;  %vm943_vm2 = vcmask 122880  }
 0x437   : > { %v683_v19 = vsel %vm682_vm1, %v681_v14, %v666_v10 }
 0x439   : > { %v678_v16 = vpop.permute.xlu0 %677 }
 0x43a   : > { %1083 = vmatmul.mubr.msk.f32.vlgmr.msra.gmra.mrb[4].mxu0 %vm656_vm14, %v678_v16  ;;  %v686_v17 = vsel %vm508_vm5, %v685_v15, %v678_v16 }
 0x43b   : > { %790 = vmatprep.mubr.f32.mxu1 %v686_v17  ;;  %1089 = vmatprep.mubr.msk.f32.mxu0 %vm1323_vm15, %v1316_v18  ;;  %v723_v18 = vld [vmem:[%s1821_s6] sm:$0x1] }
 0x43c   : > { %791 = vmatmul.mubr.f32.vlgmr.msra.gmra.mrb[4].mxu1 %v683_v19  ;;  %1198 = vmatpush3.bf16.msra.mxu0 %v1197_v22 }
 0x50d   : > { %v862_v23 = vpop.f32.mrb[4].mxu0 }
 0x50e   : > { %v1084_v24 = vpop.f32.mrb[5].mxu0 }
 0x50f   : > { %v1063_v25 = vpop.f32.mrb[4].mxu1 }
 0x510   : > { %v1064_v26 = vpop.f32.mrb[5].mxu1 }
 0x511   : > { %v1065_v27 = vadd.f32 %v1064_v26, %v1063_v25 }
 0x513   : > { %v793_v28 = vadd.f32 %v1065_v27, %v723_v18 }
 0x515   : > { %v863_v29 = vadd.f32 %v862_v23, %v793_v28 }
 0x517   : > { %v866_v30 = vmax.f32 %v863_v29, 0.0 }
 0x519   : > { %1090 = vmatmul.mubr.msk.f32.vlgmr.msra.gmra.mrb[6].mxu0 %vm652_vm12, %v866_v30 }
 0x5ec   : > { %v939_v32 = vpop.f32.mrb[6].mxu0 }
 0x5ed   : > { %v940_v33 = vadd.f32 %v939_v32, %v869_v31  ;;  %v1091_v34 = vpop.f32.mrb[7].mxu0 }
 0x5ef   : > { %944 = vst.msk [vmem:[%s324_s22] sm:$0x1] %vm943_vm2, %v940_v33 }
 0x5f0   : > { %1263 = shalt.err (!%p1260_p3)
}
 0x5f1   : > { %s1264_s17 = scalar_lea.hbm %s1773_s26, 16  ;;  %s1268_s22 = scalar_lea.hbm %s1824_s9, 32 }
 0x5f2   : > { %p1265_p4 = scmp.ne.s32.totalorder %s1773_s26, %s1264_s17  ;;  %p1269_p9 = scmp.lt.u32.totalorder %s1773_s26, %s1824_s9 }
 0x5f3   : > { %p1270_p10 = scmp.lt.u32.totalorder %s1268_s22, %s1264_s17  ;;  %p1272_p12 = scmp.lt.u32.totalorder %s1264_s17, %s1773_s26 }
 0x5f4   : > { %p1266_p7 = pnand %p1265_p4, %p1415_p5 }
 0x5f5   : > { %p1271_p11 = por %p1270_p10, %p1269_p9 }
 0x5f6   : > { %p1267_p8 = pneg %p1266_p7 }
 0x5f7   : > { %p1273_p13 = por %p1272_p12, %p1271_p11 }
 0x5f9   : > { %p1274_p0 = pnand %p1273_p13, %p1267_p8 }
 0x5fb   : > { %1277 = shalt.err (!%p1274_p0)
}
 0x5fc   : > { %1199 = dma.vmem_to_hbm [thread:$0]  (%p1415_p5), %s1775_s24, 16, %s1773_s26, %s946_s27  }
 0x5fd PF: > { %p1205_p1 = scmp.ge.s32.totalorder %s1312_s12, 2  ;;  %s970_s28 = sand.u32 1, %s1300_s30  }
 0x5fe   : > { %s971_s13 = scalar_lea.sflag [#allocation3], %s970_s28 }
 0x5ff   : > { %p1202_p2 = pnand %p1205_p1, %p1419_p6 }
 0x601   : > { %1295 = dma.done.wait (!%p1202_p2), %s971_s13, 16  }
 0x602   : > { %1297 = vsyncadd (!%p1202_p2), %s971_s13, 4294967280  ;;  %p19_p3 = scmp.ge.s32.totalorder %s1402_s15, 4   ;;  %s1831_s30 = smov %s1304_s10 }
 0x603   : > { %s1832_s10 = smov %s1308_s11  ;;  %s1833_s11 = smov %s1413_s18 }
 0x604   : > { %s1834_s12 = smov %s1402_s15  ;;  %21 = sbr.rel (!%p19_p3) target bundleno = 3 (0x3), region = 91 }
 0x60b   :  { %975 = vsyncpa [#allocation3], 1 }
 0x60c   :  { %977 = vsyncpa [#allocation3 + $0x1], 1 }

</bundles_post_ra>
